<compile_context>
chip_gen: v5e
topology: v5e:2x2
jax: 0.10.0
libtpu: 0.0.40
codegen_flags: <defaults>
</compile_context>

<pallas_src>
import jax
import jax.numpy as jnp
from jax.experimental import pallas as pl
from jax.experimental.pallas import tpu as pltpu


def _spatial_softmax_kernel(x_ref, spread_ref, o_ref):
    # x_ref:      (TM, S)  rows = flattened (batch, channel) pairs
    # spread_ref: (TM, 1)  per-row spread scalar
    # o_ref:      (TM, S)  output block
    x = x_ref[...].astype(jnp.float32)              # (TM, S)
    spread = spread_ref[...].astype(jnp.float32)    # (TM, 1)
    z = x * spread                                  # broadcast over lanes

    # Numerically-stable softmax over the (whole) spatial axis.
    m = jnp.max(z, axis=-1, keepdims=True)
    e = jnp.exp(z - m)
    denom = jnp.sum(e, axis=-1, keepdims=True)
    inv = 1.0 / denom                               # exact; only TM divides
    o_ref[...] = (e * inv).astype(o_ref.dtype)


def _choose_block_rows(R, S, max_tile_bytes):
    """Rows per block: multiple of 8 (or == R when R < 8), byte-budget sized."""
    if R <= 8:
        return R                                   # single block == full row extent
    rows = max(8, (max_tile_bytes // (S * 4)) // 8 * 8)
    rows = min(rows, (R // 8) * 8)                 # never exceed the row extent
    if R >= 16:
        # Keep >= 2 row-blocks so the "parallel" axis shards across both
        # TensorCores on v7x.
        rows = min(rows, max(8, (R // 2) // 8 * 8))
    return rows


def adaptive_spatial_softmax(x, spread, *, max_tile_bytes=4 * 1024 * 1024):
    """x: (B, C, H, W), spread: (1, C, 1). Softmax over H*W per (b, c) row."""
    B, C, H, W = x.shape
    S = H * W
    R = B * C

    tm = _choose_block_rows(R, S, max_tile_bytes)
    grid = (pl.cdiv(R, tm),)                       # ragged last block is OK

    x_flat = x.reshape(R, S)                       # free (metadata) reshape
    spread_rows = jnp.broadcast_to(spread.reshape(1, C), (B, C)).reshape(R, 1)

    # Scoped-VMEM limit scaled with the tile: ~2x in + 2x out double-buffers +
    # tile-sized f32 temporaries.  Capped at 48 MiB to stay inside v7x's 64 MiB.
    tile_f32_bytes = tm * S * 4
    vmem_limit = int(min(48 * 1024 * 1024,
                         max(32 * 1024 * 1024, 12 * tile_f32_bytes)))

    out_flat = pl.pallas_call(
        _spatial_softmax_kernel,
        out_shape=jax.ShapeDtypeStruct((R, S), x.dtype),
        grid=grid,
        in_specs=[
            pl.BlockSpec((tm, S), lambda r: (r, 0)),
            pl.BlockSpec((tm, 1), lambda r: (r, 0)),
        ],
        out_specs=pl.BlockSpec((tm, S), lambda r: (r, 0)),
        compiler_params=pltpu.CompilerParams(
            dimension_semantics=("parallel",),
            vmem_limit_bytes=vmem_limit,
        ),
    )(x_flat, spread_rows)

    return out_flat.reshape(B, C, H, W)


def reference(x, spread):
    B, C, H, W = x.shape
    inp = x.reshape(B, C, -1).astype(jnp.float32)
    res = inp * spread.astype(jnp.float32)
    res = jax.nn.softmax(res, axis=2)
    return res.reshape(B, C, H, W).astype(x.dtype)


if __name__ == "__main__":
    key = jax.random.PRNGKey(0)

    # Main test shape (module-consistent): B=2, C=4, 16x16 feature map.
    B, C, H, W = 2, 4, 16, 16
    kx, ks = jax.random.split(key)
    x = jax.random.normal(kx, (B, C, H, W), dtype=jnp.float32)
    # Module default is torch.ones(1, C, 1); perturb so spread matters.
    spread = jnp.ones((1, C, 1), dtype=jnp.float32) + \
        0.1 * jax.random.normal(ks, (1, C, 1), dtype=jnp.float32)

    out = adaptive_spatial_softmax(x, spread)
    jax.block_until_ready(out)
    ref = reference(x, spread)
    assert out.shape == (B, C, H, W)
    assert jnp.allclose(out, ref, atol=1e-5, rtol=1e-3), "mismatch vs reference"

    # Second shape: S=49 (not a multiple of 128) and R=6 (< 8 rows) -- exercises
    # the full-extent (no-pad) block path.
    B2, C2, H2, W2 = 2, 3, 7, 7
    kx2, ks2 = jax.random.split(jax.random.PRNGKey(1))
    x2 = jax.random.normal(kx2, (B2, C2, H2, W2), dtype=jnp.float32)
    spread2 = jnp.ones((1, C2, 1), dtype=jnp.float32) + \
        0.1 * jax.random.normal(ks2, (1, C2, 1), dtype=jnp.float32)

    out2 = adaptive_spatial_softmax(x2, spread2)
    jax.block_until_ready(out2)
    ref2 = reference(x2, spread2)
    assert out2.shape == (B2, C2, H2, W2)
    assert jnp.allclose(out2, ref2, atol=1e-5, rtol=1e-3), "mismatch (S=49, R=6)"

    # Third shape: module-default num_channel=14 -> R=28, tm=8, grid=4 with a
    # ragged last row-block (OOB rows dropped) -- exercises the multi-block path.
    B3, C3, H3, W3 = 2, 14, 16, 16
    kx3, ks3 = jax.random.split(jax.random.PRNGKey(2))
    x3 = jax.random.normal(kx3, (B3, C3, H3, W3), dtype=jnp.float32)
    spread3 = jnp.ones((1, C3, 1), dtype=jnp.float32) + \
        0.1 * jax.random.normal(ks3, (1, C3, 1), dtype=jnp.float32)

    out3 = adaptive_spatial_softmax(x3, spread3)
    jax.block_until_ready(out3)
    ref3 = reference(x3, spread3)
    assert out3.shape == (B3, C3, H3, W3)
    assert jnp.allclose(out3, ref3, atol=1e-5, rtol=1e-3), "mismatch (ragged rows)"

    print("KERNEL_OK")
</pallas_src>

<mosaic_0001>
module attributes {stable_mosaic.version = 11 : i64} {
  func.func @_spatial_softmax_kernel(%arg0: i32, %arg1: memref<8x256xf32, #tpu.memory_space<vmem>>, %arg2: memref<8x1xf32, #tpu.memory_space<vmem>>, %arg3: memref<8x256xf32, #tpu.memory_space<vmem>>) attributes {dimension_semantics = [#tpu.dimension_semantics<parallel>], iteration_bounds = array<i64: 1>, scalar_prefetch = 0 : i64, scratch_operands = 0 : i64, tpu.core_type = #tpu.core_type<tc>, window_params = [{transform_indices = @transform_0, window_bounds = array<i64: 8, 256>}, {transform_indices = @transform_1, window_bounds = array<i64: 8, 1>}, {transform_indices = @transform_2, window_bounds = array<i64: 8, 256>}]} {
    %c0 = arith.constant 0 : index
    %c0_0 = arith.constant 0 : index
    %0 = vector.load %arg1[%c0, %c0_0] : memref<8x256xf32, #tpu.memory_space<vmem>>, vector<8x256xf32>
    %c0_1 = arith.constant 0 : index
    %c0_2 = arith.constant 0 : index
    %1 = vector.load %arg2[%c0_1, %c0_2] : memref<8x1xf32, #tpu.memory_space<vmem>>, vector<8x1xf32>
    %2 = vector.broadcast %1 : vector<8x1xf32> to vector<8x256xf32>
    %3 = arith.mulf %0, %2 : vector<8x256xf32>
    %cst = arith.constant dense<0xFF800000> : vector<8xf32>
    %4 = vector.multi_reduction <maximumf>, %3, %cst [1] : vector<8x256xf32> to vector<8xf32>
    %5 = vector.shape_cast %4 : vector<8xf32> to vector<8x1xf32>
    %6 = vector.broadcast %5 : vector<8x1xf32> to vector<8x256xf32>
    %7 = arith.subf %3, %6 : vector<8x256xf32>
    %8 = math.exp %7 : vector<8x256xf32>
    %cst_3 = arith.constant dense<0.000000e+00> : vector<8xf32>
    %9 = vector.multi_reduction <add>, %8, %cst_3 [1] : vector<8x256xf32> to vector<8xf32>
    %10 = vector.shape_cast %9 : vector<8xf32> to vector<8x1xf32>
    %cst_4 = arith.constant 1.000000e+00 : f32
    %11 = vector.broadcast %cst_4 : f32 to vector<8x1xf32>
    %12 = arith.divf %11, %10 : vector<8x1xf32>
    %13 = vector.broadcast %12 : vector<8x1xf32> to vector<8x256xf32>
    %14 = arith.mulf %8, %13 : vector<8x256xf32>
    %c0_5 = arith.constant 0 : index
    %c0_6 = arith.constant 0 : index
    %15 = vector.load %arg3[%c0_5, %c0_6] : memref<8x256xf32, #tpu.memory_space<vmem>>, vector<8x256xf32>
    tpu.vector_store %arg3[%c0_5, %c0_6], %14 {strides = array<i32>} : memref<8x256xf32, #tpu.memory_space<vmem>>, vector<8x256xf32>,
    return
  }
  func.func @transform_0(%arg0: i32) -> (i32, i32) {
    %c0_i32 = arith.constant 0 : i32
    %c0_i32_0 = arith.constant 0 : i32
    return %arg0, %c0_i32 : i32, i32
  }
  func.func @transform_1(%arg0: i32) -> (i32, i32) {
    %c0_i32 = arith.constant 0 : i32
    %c0_i32_0 = arith.constant 0 : i32
    return %arg0, %c0_i32 : i32, i32
  }
  func.func @transform_2(%arg0: i32) -> (i32, i32) {
    %c0_i32 = arith.constant 0 : i32
    %c0_i32_0 = arith.constant 0 : i32
    return %arg0, %c0_i32 : i32, i32
  }
}

</mosaic_0001>

<bundles_post_ra>
// kernel: tpu_custom_call.1
= control target key start
LH: loop header
LB: loop body
LE: loop exit
PB: predicated region body
PF: predicated region fallthrough
CT: control target
= control target key end

     0   :  { %7 = vsyncpa [#allocation3], 0  ;;  %s173_s0 = inlined_call_operand.hbm [shape: f32[8,256], index: 0, kind: input, shape index: {}]   ;;  %s174_s1 = inlined_call_operand.vmem [shape: f32[8,1], index: 1, kind: input, shape index: {}]   ;;  %s175_s2 = inlined_call_operand.hbm [shape: f32[8,256], index: 2, kind: output, shape index: {}]  }
   0x1   :  { %8 = vsyncpa [#allocation4], 0  ;;  %s14_s11 = sshll.u32 %s173_s0, 4  ;;  %s146_s12 = smov [#allocation2]   ;;  %s15_s11 = int_to_ptr.hbm [resolvable:$true] %s14_s11 }
   0x2   :  { %s16_s13 = sshll.u32 %s146_s12, 4  ;;  %s17_s13 = int_to_ptr.vmem [resolvable:$true] %s16_s13 }
   0x3   :  { %19 = dma.hbm_to_vmem [thread:$0]  %s15_s11, 256, %s17_s13, [#allocation3]  }
   0x4   :  { %142 = dma.done.wait [#allocation3], 256  }
   0x5   :  { %143 = vsyncadd [#allocation3], 4294967040  ;;  %v147_v0 = vmov 0   ;;  %v28_v1 = vld [vmem:[%s174_s1] sm:$0xff]  ;;  %v27_v3 = vld [vmem:[#allocation2 + $0x8] sm:$0xff]  ;;  %s148_s0 = smov [#allocation5]  }
   0x6   :  { %87 = vset.pattern.permute.xlu0 %v147_v0  ;;  %v26_v2 = vld [vmem:[#allocation2] sm:$0xff]  ;;  %s72_s1 = sshll.u32 %s148_s0, 4  ;;  %s74_s18 = sshll.u32 %s175_s2, 4  ;;  %s73_s1 = int_to_ptr.vmem [resolvable:$true] %s72_s1  ;;  %s75_s18 = int_to_ptr.hbm [resolvable:$true] %s74_s18 }
   0x7   :  { %31 = vperm.xlu0 %87, %v28_v1  }
  0x79   :  { %v32_v4 = vpop.permute.xlu0 %31 }
  0x7a   :  { %v34_v5 = vmul.f32 %v32_v4, %v26_v2  ;;  %v35_v6 = vmul.f32 %v32_v4, %v27_v3 }
  0x7c   :  { %v36_v7 = vmax.f32 %v34_v5, %v35_v6 }
  0x7e   :  { %37 = vmax.xlane.f32.xlu0 %v36_v7 }
  0xf1   :  { %v38_v8 = vpop.xlane.xlu0 %37 }
  0xf2   :  { %v39_v9 = vsub.f32 %v34_v5, %v38_v8  ;;  %v40_v10 = vsub.f32 %v35_v6, %v38_v8 }
  0xf4   :  { %v41_v11 = vmul.f32 1.442695, %v39_v9  ;;  %v43_v12 = vmul.f32 1.442695, %v40_v10 }
  0xf6   :  { %88 = vpow2.f32 %v41_v11 }
  0xf7   :  { %90 = vpow2.f32 %v43_v12 }
  0xfc   :  { %v89_v13 = vpop.eup %88 }
  0xfd   :  { %v91_v14 = vpop.eup %90 }
  0xfe   :  { %v45_v15 = vadd.f32 %v91_v14, %v89_v13 }
 0x100   :  { %46 = vadd.xlane.f32.xlu1 %v45_v15 }
 0x173   :  { %v47_v16 = vpop.xlane.xlu1 %46 }
 0x174   :  { %92 = vrcp.f32 %v47_v16  ;;  %v59_v20 = vand.u32 2147483648, %v47_v16  ;;  %v57_v22 = vand.u32 2147483647, %v47_v16  ;;  %vm53_vm1 = vweird.f32 %v47_v16 }
 0x176   :  { %v60_v24 = vor.u32 1.1754944e-38, %v59_v20  ;;  %vm58_vm3 = vcmp.eq.f32.partialorder %v57_v22, 8.507059e+37 }
 0x17a   :  { %v93_v17 = vpop.eup %92 }
 0x17b   :  { %v49_v18 = vmul.f32 %v93_v17, %v47_v16  ;;  %vm54_vm0 = vweird.f32 %v93_v17 }
 0x17c   :  { %vm55_vm2 = vmor %vm53_vm1, %vm54_vm0 }
 0x17d   :  { %v50_v19 = vsub.f32 1.0, %v49_v18 }
 0x17f   :  { %v51_v21 = vmul.f32 %v93_v17, %v50_v19 }
 0x181   :  { %v52_v23 = vadd.f32 %v93_v17, %v51_v21 }
 0x183   :  { %v56_v25 = vsel %vm55_vm2, %v93_v17, %v52_v23 }
 0x184   :  { %v61_v26 = vsel %vm58_vm3, %v60_v24, %v56_v25 }
 0x185   :  { %v63_v27 = vmul.f32 %v89_v13, %v61_v26  ;;  %v64_v28 = vmul.f32 %v91_v14, %v61_v26 }
 0x187   :  { %65 = vst [vmem:[#allocation5] sm:$0xff] %v63_v27 }
 0x188   :  { %66 = vst [vmem:[#allocation5 + $0x8] sm:$0xff] %v64_v28 }
 0x189   :  { %77 = dma.vmem_to_hbm [thread:$0]  %s73_s1, 256, %s75_s18, [#allocation4]  }
 0x18a   :  { %144 = dma.done.wait [#allocation4], 256  }
 0x18b   :  { %145 = vsyncadd [#allocation4], 4294967040 }
 0x18c   :  { %82 = vsyncpa [#allocation3], 1 }
 0x18d   :  { %83 = vsyncpa [#allocation4], 1 }

</bundles_post_ra>
